<compile_context>
chip_gen: v6e
topology: v6e:2x2x1
jax: 0.10.0
libtpu: 0.0.40
codegen_flags: <defaults>
</compile_context>

<pallas_src>
import jax
import jax.numpy as jnp
from jax.experimental import pallas as pl
from jax.experimental.pallas import tpu as pltpu

N_FEAT = 73
H1, H2 = 64, 32


def _round_up(v, m):
    return (v + m - 1) // m * m


def _gelu_exact(v):
    # PyTorch nn.GELU(default, approximate='none'): 0.5*x*(1+erf(x/sqrt(2))).
    # NOTE: tanh-approx GELU would move the transcendental to the EUP slot,
    # but deviates from PyTorch's exact erf GELU; kept exact for parity.
    return 0.5 * v * (1.0 + jax.lax.erf(v * 0.7071067811865476))


def mynet_kernel(xt_ref, w1_ref, b1_ref, w2_ref, b2_ref,
                 wr_ref, br_ref, w6_ref, b6_ref, o_ref):
    xt = xt_ref[...]                                        # (73, TM) f32
    # f1 (gamma already folded into w1_ref by the wrapper)
    h = _gelu_exact(jnp.dot(w1_ref[...], xt,
                            preferred_element_type=jnp.float32) + b1_ref[...])
    # f2
    h = _gelu_exact(jnp.dot(w2_ref[...], h,
                            preferred_element_type=jnp.float32) + b2_ref[...])
    # TODO(synk): Dropout(p=0.12) treated as eval-mode identity (no stochastic mask).
    # res + residual add
    h = _gelu_exact(jnp.dot(wr_ref[...], h,
                            preferred_element_type=jnp.float32) + br_ref[...] + h)
    # f6 (+ g folded into b6_ref); (1, TM) lane-dense store
    o_ref[...] = jnp.dot(w6_ref[...], h,
                         preferred_element_type=jnp.float32) + b6_ref[...]


def mynet_forward(x, params, tm=512):
    (alpha, beta, gamma, g,
     w1, b1, w2, b2, wr, br, w6, b6) = params
    n = x.shape[0]

    # Batch tile on the lane dim: multiple of 128, modest VMEM footprint
    # (TM=512 working set ≈ 1 MiB incl. double buffering -> safe on v5e's
    # 16 MiB scoped default and v7x's 64 MiB physical VMEM).
    tm = min(tm, _round_up(max(n, 1), 128))
    npad = _round_up(n, tm)
    n_tiles = npad // tm

    # ---- glue (plain JAX): gathers + layout/weight prep ----
    a_idx = x[:, 0].astype(jnp.int32)               # .int() truncation (vals >= 0)
    b_idx = x[:, 1].astype(jnp.int32)
    xf = x.at[:, 0].set(jnp.take(alpha, a_idx))
    xf = xf.at[:, 1].set(jnp.take(beta, b_idx))
    if npad != n:
        xf = jnp.pad(xf, ((0, npad - n), (0, 0)))
    xt = xf.T                                        # (73, Npad): batch on lanes

    # Fold "x[:, 3:23] *= gamma[3:23]" into rows 3..22 of w1; fold "+ g" into b6.
    scale = jnp.ones((N_FEAT,), jnp.float32).at[3:23].set(gamma[3:23])
    w1t = (w1 * scale[:, None]).T                    # (64, 73)
    w2t = w2.T                                       # (32, 64)
    wrt = wr.T                                       # (32, 32)
    w6t = w6.T                                       # (1, 32)
    b1c = b1[:, None]                                # (64, 1)
    b2c = b2[:, None]                                # (32, 1)
    brc = br[:, None]                                # (32, 1)
    b6g = (b6 + g).reshape(1, 1)                     # (1, 1)

    def const_spec(a):                               # resident across all grid steps
        return pl.BlockSpec(a.shape, lambda i: (0, 0))

    out = pl.pallas_call(
        mynet_kernel,
        out_shape=jax.ShapeDtypeStruct((1, npad), jnp.float32),
        grid=(n_tiles,),
        in_specs=[pl.BlockSpec((N_FEAT, tm), lambda i: (0, i)),
                  const_spec(w1t), const_spec(b1c),
                  const_spec(w2t), const_spec(b2c),
                  const_spec(wrt), const_spec(brc),
                  const_spec(w6t), const_spec(b6g)],
        out_specs=pl.BlockSpec((1, tm), lambda i: (0, i)),
        compiler_params=pltpu.CompilerParams(
            dimension_semantics=("parallel",),        # 2 TCs on v7x; no-op v5e/v6e
            vmem_limit_bytes=32 * 1024 * 1024),
    )(xt, w1t, b1c, w2t, b2c, wrt, brc, w6t, b6g)

    return out[0, :n][:, None]                       # (N, 1)


def mynet_reference(x, params):
    """Pure-JAX reference for correctness checking (matches PyTorch forward)."""
    (alpha, beta, gamma, g,
     w1, b1, w2, b2, wr, br, w6, b6) = params
    a_idx = x[:, 0].astype(jnp.int32)
    b_idx = x[:, 1].astype(jnp.int32)
    x = x.at[:, 0].set(jnp.take(alpha, a_idx))
    x = x.at[:, 1].set(jnp.take(beta, b_idx))
    x = x.at[:, 3:23].multiply(gamma[3:23][None, :])
    h = _gelu_exact(x @ w1 + b1)
    h = _gelu_exact(h @ w2 + b2)
    h = _gelu_exact(h @ wr + br + h)
    return h @ w6 + b6 + g


def init_params(key):
    ks = jax.random.split(key, 12)
    alpha = 0.1 * jax.random.normal(ks[0], (1000,), jnp.float32)
    beta = 0.1 * jax.random.normal(ks[1], (10000,), jnp.float32)
    gamma = 0.1 * jax.random.normal(ks[2], (24,), jnp.float32)
    g = jnp.float32(1.0)
    w1 = 0.1 * jax.random.normal(ks[3], (N_FEAT, H1), jnp.float32)
    b1 = 0.1 * jax.random.normal(ks[4], (H1,), jnp.float32)
    w2 = 0.1 * jax.random.normal(ks[5], (H1, H2), jnp.float32)
    b2 = 0.1 * jax.random.normal(ks[6], (H2,), jnp.float32)
    wr = 0.1 * jax.random.normal(ks[7], (H2, H2), jnp.float32)
    br = 0.1 * jax.random.normal(ks[8], (H2,), jnp.float32)
    w6 = 0.1 * jax.random.normal(ks[9], (H2, 1), jnp.float32)
    b6 = 0.1 * jax.random.normal(ks[10], (1,), jnp.float32)
    return (alpha, beta, gamma, g, w1, b1, w2, b2, wr, br, w6, b6)


if __name__ == "__main__":
    key = jax.random.PRNGKey(0)
    pkey, xkey, ikey_a, ikey_b = jax.random.split(key, 4)
    params = init_params(pkey)

    batch = 8
    x = jax.random.normal(xkey, (batch, N_FEAT), jnp.float32)
    # Columns 0 / 1 hold integer-valued indices into alpha (1000) / beta (10000).
    a = jax.random.randint(ikey_a, (batch,), 0, 1000).astype(jnp.float32)
    b = jax.random.randint(ikey_b, (batch,), 0, 10000).astype(jnp.float32)
    x = x.at[:, 0].set(a).at[:, 1].set(b)

    out = mynet_forward(x, params)
    out = jax.block_until_ready(out)

    ref = mynet_reference(x, params)
    assert out.shape == (batch, 1)
    assert jnp.allclose(out, ref, atol=1e-5, rtol=1e-5), (out, ref)

    print("KERNEL_OK")
</pallas_src>

<mosaic_0001>
module attributes {stable_mosaic.version = 11 : i64} {
  func.func @mynet_kernel(%arg0: i32, %arg1: memref<73x128xf32, #tpu.memory_space<vmem>>, %arg2: memref<64x73xf32, #tpu.memory_space<vmem>>, %arg3: memref<64x1xf32, #tpu.memory_space<vmem>>, %arg4: memref<32x64xf32, #tpu.memory_space<vmem>>, %arg5: memref<32x1xf32, #tpu.memory_space<vmem>>, %arg6: memref<32x32xf32, #tpu.memory_space<vmem>>, %arg7: memref<32x1xf32, #tpu.memory_space<vmem>>, %arg8: memref<1x32xf32, #tpu.memory_space<vmem>>, %arg9: memref<1x1xf32, #tpu.memory_space<vmem>>, %arg10: memref<1x128xf32, #tpu.memory_space<vmem>>) attributes {dimension_semantics = [#tpu.dimension_semantics<parallel>], iteration_bounds = array<i64: 1>, scalar_prefetch = 0 : i64, scratch_operands = 0 : i64, tpu.core_type = #tpu.core_type<tc>, window_params = [{transform_indices = @transform_0, window_bounds = array<i64: 73, 128>}, {pipeline_mode = #tpu.pipeline_mode<synchronous>, transform_indices = @transform_1, window_bounds = array<i64: 64, 73>}, {pipeline_mode = #tpu.pipeline_mode<synchronous>, transform_indices = @transform_2, window_bounds = array<i64: 64, 1>}, {pipeline_mode = #tpu.pipeline_mode<synchronous>, transform_indices = @transform_3, window_bounds = array<i64: 32, 64>}, {pipeline_mode = #tpu.pipeline_mode<synchronous>, transform_indices = @transform_4, window_bounds = array<i64: 32, 1>}, {pipeline_mode = #tpu.pipeline_mode<synchronous>, transform_indices = @transform_5, window_bounds = array<i64: 32, 32>}, {pipeline_mode = #tpu.pipeline_mode<synchronous>, transform_indices = @transform_6, window_bounds = array<i64: 32, 1>}, {pipeline_mode = #tpu.pipeline_mode<synchronous>, transform_indices = @transform_7, window_bounds = array<i64: 1, 32>}, {pipeline_mode = #tpu.pipeline_mode<synchronous>, transform_indices = @transform_8, window_bounds = array<i64: 1, 1>}, {transform_indices = @transform_9, window_bounds = array<i64: 1, 128>}]} {
    %c0 = arith.constant 0 : index
    %c0_0 = arith.constant 0 : index
    %0 = vector.load %arg1[%c0, %c0_0] : memref<73x128xf32, #tpu.memory_space<vmem>>, vector<73x128xf32>
    %c0_1 = arith.constant 0 : index
    %c0_2 = arith.constant 0 : index
    %1 = vector.load %arg2[%c0_1, %c0_2] : memref<64x73xf32, #tpu.memory_space<vmem>>, vector<64x73xf32>
    %cst = arith.constant dense<0.000000e+00> : vector<64x128xf32>
    %2 = tpu.matmul %1, %0, %cst {dimension_numbers = #tpu.dot_dimension_numbers<[1], [0], [0], [1], [0, 0, 1, 1], [], []>} : vector<64x73xf32>, vector<73x128xf32>, vector<64x128xf32> -> vector<64x128xf32>
    %c0_3 = arith.constant 0 : index
    %c0_4 = arith.constant 0 : index
    %3 = vector.load %arg3[%c0_3, %c0_4] : memref<64x1xf32, #tpu.memory_space<vmem>>, vector<64x1xf32>
    %4 = vector.broadcast %3 : vector<64x1xf32> to vector<64x128xf32>
    %5 = arith.addf %2, %4 : vector<64x128xf32>
    %cst_5 = arith.constant 5.000000e-01 : f32
    %6 = vector.broadcast %cst_5 : f32 to vector<64x128xf32>
    %7 = arith.mulf %6, %5 : vector<64x128xf32>
    %cst_6 = arith.constant 0.707106769 : f32
    %8 = vector.broadcast %cst_6 : f32 to vector<64x128xf32>
    %9 = arith.mulf %5, %8 : vector<64x128xf32>
    %10 = math.erf %9 : vector<64x128xf32>
    %cst_7 = arith.constant 1.000000e+00 : f32
    %11 = vector.broadcast %cst_7 : f32 to vector<64x128xf32>
    %12 = arith.addf %11, %10 : vector<64x128xf32>
    %13 = arith.mulf %7, %12 : vector<64x128xf32>
    %c0_8 = arith.constant 0 : index
    %c0_9 = arith.constant 0 : index
    %14 = vector.load %arg4[%c0_8, %c0_9] : memref<32x64xf32, #tpu.memory_space<vmem>>, vector<32x64xf32>
    %cst_10 = arith.constant dense<0.000000e+00> : vector<32x128xf32>
    %15 = tpu.matmul %14, %13, %cst_10 {dimension_numbers = #tpu.dot_dimension_numbers<[1], [0], [0], [1], [0, 0, 1, 1], [], []>} : vector<32x64xf32>, vector<64x128xf32>, vector<32x128xf32> -> vector<32x128xf32>
    %c0_11 = arith.constant 0 : index
    %c0_12 = arith.constant 0 : index
    %16 = vector.load %arg5[%c0_11, %c0_12] : memref<32x1xf32, #tpu.memory_space<vmem>>, vector<32x1xf32>
    %17 = vector.broadcast %16 : vector<32x1xf32> to vector<32x128xf32>
    %18 = arith.addf %15, %17 : vector<32x128xf32>
    %cst_13 = arith.constant 5.000000e-01 : f32
    %19 = vector.broadcast %cst_13 : f32 to vector<32x128xf32>
    %20 = arith.mulf %19, %18 : vector<32x128xf32>
    %cst_14 = arith.constant 0.707106769 : f32
    %21 = vector.broadcast %cst_14 : f32 to vector<32x128xf32>
    %22 = arith.mulf %18, %21 : vector<32x128xf32>
    %23 = math.erf %22 : vector<32x128xf32>
    %cst_15 = arith.constant 1.000000e+00 : f32
    %24 = vector.broadcast %cst_15 : f32 to vector<32x128xf32>
    %25 = arith.addf %24, %23 : vector<32x128xf32>
    %26 = arith.mulf %20, %25 : vector<32x128xf32>
    %c0_16 = arith.constant 0 : index
    %c0_17 = arith.constant 0 : index
    %27 = vector.load %arg6[%c0_16, %c0_17] : memref<32x32xf32, #tpu.memory_space<vmem>>, vector<32x32xf32>
    %cst_18 = arith.constant dense<0.000000e+00> : vector<32x128xf32>
    %28 = tpu.matmul %27, %26, %cst_18 {dimension_numbers = #tpu.dot_dimension_numbers<[1], [0], [0], [1], [0, 0, 1, 1], [], []>} : vector<32x32xf32>, vector<32x128xf32>, vector<32x128xf32> -> vector<32x128xf32>
    %c0_19 = arith.constant 0 : index
    %c0_20 = arith.constant 0 : index
    %29 = vector.load %arg7[%c0_19, %c0_20] : memref<32x1xf32, #tpu.memory_space<vmem>>, vector<32x1xf32>
    %30 = vector.broadcast %29 : vector<32x1xf32> to vector<32x128xf32>
    %31 = arith.addf %28, %30 : vector<32x128xf32>
    %32 = arith.addf %31, %26 : vector<32x128xf32>
    %cst_21 = arith.constant 5.000000e-01 : f32
    %33 = vector.broadcast %cst_21 : f32 to vector<32x128xf32>
    %34 = arith.mulf %33, %32 : vector<32x128xf32>
    %cst_22 = arith.constant 0.707106769 : f32
    %35 = vector.broadcast %cst_22 : f32 to vector<32x128xf32>
    %36 = arith.mulf %32, %35 : vector<32x128xf32>
    %37 = math.erf %36 : vector<32x128xf32>
    %cst_23 = arith.constant 1.000000e+00 : f32
    %38 = vector.broadcast %cst_23 : f32 to vector<32x128xf32>
    %39 = arith.addf %38, %37 : vector<32x128xf32>
    %40 = arith.mulf %34, %39 : vector<32x128xf32>
    %c0_24 = arith.constant 0 : index
    %c0_25 = arith.constant 0 : index
    %41 = vector.load %arg8[%c0_24, %c0_25] : memref<1x32xf32, #tpu.memory_space<vmem>>, vector<1x32xf32>
    %cst_26 = arith.constant dense<0.000000e+00> : vector<1x128xf32>
    %42 = tpu.matmul %41, %40, %cst_26 {dimension_numbers = #tpu.dot_dimension_numbers<[1], [0], [0], [1], [0, 0, 1, 1], [], []>} : vector<1x32xf32>, vector<32x128xf32>, vector<1x128xf32> -> vector<1x128xf32>
    %c0_27 = arith.constant 0 : index
    %c0_28 = arith.constant 0 : index
    %43 = vector.load %arg9[%c0_27, %c0_28] : memref<1x1xf32, #tpu.memory_space<vmem>>, vector<1x1xf32>
    %44 = vector.broadcast %43 : vector<1x1xf32> to vector<1x128xf32>
    %45 = arith.addf %42, %44 : vector<1x128xf32>
    %c0_29 = arith.constant 0 : index
    %c0_30 = arith.constant 0 : index
    %46 = vector.load %arg10[%c0_29, %c0_30] : memref<1x128xf32, #tpu.memory_space<vmem>>, vector<1x128xf32>
    tpu.vector_store %arg10[%c0_29, %c0_30], %45 {strides = array<i32>} : memref<1x128xf32, #tpu.memory_space<vmem>>, vector<1x128xf32>,
    return
  }
  func.func @transform_0(%arg0: i32) -> (i32, i32) {
    %c0_i32 = arith.constant 0 : i32
    %c0_i32_0 = arith.constant 0 : i32
    return %c0_i32, %arg0 : i32, i32
  }
  func.func @transform_1(%arg0: i32) -> (i32, i32) {
    %c0_i32 = arith.constant 0 : i32
    %c0_i32_0 = arith.constant 0 : i32
    %c0_i32_1 = arith.constant 0 : i32
    return %c0_i32, %c0_i32_0 : i32, i32
  }
  func.func @transform_2(%arg0: i32) -> (i32, i32) {
    %c0_i32 = arith.constant 0 : i32
    %c0_i32_0 = arith.constant 0 : i32
    %c0_i32_1 = arith.constant 0 : i32
    return %c0_i32, %c0_i32_0 : i32, i32
  }
  func.func @transform_3(%arg0: i32) -> (i32, i32) {
    %c0_i32 = arith.constant 0 : i32
    %c0_i32_0 = arith.constant 0 : i32
    %c0_i32_1 = arith.constant 0 : i32
    return %c0_i32, %c0_i32_0 : i32, i32
  }
  func.func @transform_4(%arg0: i32) -> (i32, i32) {
    %c0_i32 = arith.constant 0 : i32
    %c0_i32_0 = arith.constant 0 : i32
    %c0_i32_1 = arith.constant 0 : i32
    return %c0_i32, %c0_i32_0 : i32, i32
  }
  func.func @transform_5(%arg0: i32) -> (i32, i32) {
    %c0_i32 = arith.constant 0 : i32
    %c0_i32_0 = arith.constant 0 : i32
    %c0_i32_1 = arith.constant 0 : i32
    return %c0_i32, %c0_i32_0 : i32, i32
  }
  func.func @transform_6(%arg0: i32) -> (i32, i32) {
    %c0_i32 = arith.constant 0 : i32
    %c0_i32_0 = arith.constant 0 : i32
    %c0_i32_1 = arith.constant 0 : i32
    return %c0_i32, %c0_i32_0 : i32, i32
  }
  func.func @transform_7(%arg0: i32) -> (i32, i32) {
    %c0_i32 = arith.constant 0 : i32
    %c0_i32_0 = arith.constant 0 : i32
    %c0_i32_1 = arith.constant 0 : i32
    return %c0_i32, %c0_i32_0 : i32, i32
  }
  func.func @transform_8(%arg0: i32) -> (i32, i32) {
    %c0_i32 = arith.constant 0 : i32
    %c0_i32_0 = arith.constant 0 : i32
    %c0_i32_1 = arith.constant 0 : i32
    return %c0_i32, %c0_i32_0 : i32, i32
  }
  func.func @transform_9(%arg0: i32) -> (i32, i32) {
    %c0_i32 = arith.constant 0 : i32
    %c0_i32_0 = arith.constant 0 : i32
    return %c0_i32, %arg0 : i32, i32
  }
}

</mosaic_0001>

<bundles_post_ra>
// kernel: tpu_custom_call.1
= control target key start
LH: loop header
LB: loop body
LE: loop exit
PB: predicated region body
PF: predicated region fallthrough
CT: control target
= control target key end

     0   :  { %s1128_s0 = inlined_call_operand.vmem [shape: f32[73,128], index: 0, kind: input, shape index: {}]   ;;  %s1129_s1 = inlined_call_operand.hbm [shape: f32[64,73], index: 1, kind: input, shape index: {}]   ;;  %s1130_s2 = inlined_call_operand.vmem [shape: f32[64,1], index: 2, kind: input, shape index: {}]   ;;  %s1131_s3 = inlined_call_operand.vmem [shape: f32[32,64], index: 3, kind: input, shape index: {}]   ;;  %s1132_s4 = inlined_call_operand.vmem [shape: f32[32,1], index: 4, kind: input, shape index: {}]   ;;  %s1133_s5 = inlined_call_operand.hbm [shape: f32[32,32], index: 5, kind: input, shape index: {}]   ;;  %s1134_s6 = inlined_call_operand.vmem [shape: f32[32,1], index: 6, kind: input, shape index: {}]   ;;  %s1135_s7 = inlined_call_operand.vmem [shape: f32[1,32], index: 7, kind: input, shape index: {}]   ;;  %s1136_s8 = inlined_call_operand.<no memory space> [shape: f32[1,1], index: 8, kind: input, shape index: {}]   ;;  %s1137_s9 = inlined_call_operand.hbm [shape: f32[1,128], index: 9, kind: output, shape index: {}]  }
   0x1   :  { %v14_v0 = vstv %s1136_s8 }
   0x2   :  { %15 = vst [vmem:[#allocation2] sm:$0x1] %v14_v0 }
   0x3   :  { %16 = vsyncpa [#allocation4], 0 }
   0x4   :  { %17 = vsyncpa [#allocation7], 0 }
   0x5   :  { %18 = vsyncpa [#allocation5], 0  ;;  %s948_s11 = smov [#allocation3]  }
   0x6   :  { %s26_s12 = sshll.u32 %s948_s11, 4  ;;  %s27_s12 = int_to_ptr.vmem [resolvable:$true] %s26_s12 }
   0x7   :  { %s890_s13 = scalar_lea.vmem %s27_s12, 1024  ;;  %p895_p1 = scmp.lt.s32.totalorder %s27_s12, %s27_s12 }
   0x8   :  { %p891_p0 = scmp.ne.s32.totalorder %s27_s12, %s890_s13  ;;  %p896_p2 = scmp.lt.s32.totalorder %s890_s13, %s890_s13 }
   0xa   :  { %p897_p3 = por %p896_p2, %p895_p1 }
   0xc   :  { %p898_p4 = pnand %p897_p3, %p891_p0 }
   0xe   :  { %901 = shalt.err (!%p898_p4)
}
   0xf   :  { %s949_s14 = smov 128   ;;  %s950_s15 = smov 8  }
  0x10   :  { %32 = dma.hbm_to_vmem [thread:$0]  %s1129_s1, 1024, %s27_s12, [#allocation4], %s949_s14, %s949_s14, %s950_s15  }
  0x11   :  { %s951_s8 = smov [#allocation6]  }
  0x12   :  { %s44_s18 = sshll.u32 %s951_s8, 4  ;;  %s45_s18 = int_to_ptr.vmem [resolvable:$true] %s44_s18 }
  0x13   :  { %s910_s19 = scalar_lea.vmem %s45_s18, 512  ;;  %p915_p6 = scmp.lt.s32.totalorder %s45_s18, %s45_s18 }
  0x14   :  { %p911_p5 = scmp.ne.s32.totalorder %s45_s18, %s910_s19  ;;  %p916_p7 = scmp.lt.s32.totalorder %s910_s19, %s910_s19 }
  0x16   :  { %p917_p8 = por %p916_p7, %p915_p6 }
  0x18   :  { %p918_p9 = pnand %p917_p8, %p911_p5 }
  0x1a   :  { %921 = shalt.err (!%p918_p9)
}
  0x1b   :  { %50 = dma.hbm_to_vmem [thread:$0]  %s1133_s5, 512, %s45_s18, [#allocation7], %s949_s14, %s949_s14, %s950_s15  }
  0x1c   :  { %942 = dma.done.wait [#allocation4], 1024  }
  0x1d   :  { %943 = vsyncadd [#allocation4], 4294966272 }
  0x1e   :  { %944 = dma.done.wait [#allocation7], 512  }
  0x1f   :  { %945 = vsyncadd [#allocation7], 4294966784  ;;  %v952_v1 = vmov 0   ;;  %vm154_vm0 = vcmask 1040384   ;;  %v72_v2 = vld [vmem:[%s1128_s0 + $0x48] sm:$0x1] }
  0x20   :  { %848 = vset.pattern.permute.xlu0 %v952_v1  ;;  %849 = vset.pattern.permute.xlu1 %v952_v1  ;;  %v71_v3 = vld [vmem:[%s1128_s0 + $0x40] sm:$0xff]  ;;  %vm129_vm1 = vcmask 596992   ;;  %v70_v4 = vld [vmem:[%s1128_s0 + $0x38] sm:$0xff]  ;;  %v69_v6 = vld [vmem:[%s1128_s0 + $0x30] sm:$0xff]  ;;  %vm331_vm2 = vcmask 523264   ;;  %vm477_vm3 = vcmask 261120  }
  0x21   :  { %761 = vmatprep.subr.msk.mxu0 %vm154_vm0, %v72_v2  ;;  %v73_v5 = vld [vmem:[#allocation3] sm:$0xff]  ;;  %v88_v8 = vld [vmem:[%s1130_s2 + $0x38] sm:$0xff]  ;;  %v87_v11 = vld [vmem:[%s1130_s2 + $0x30] sm:$0xff]  ;;  %vm954_vm4 = vmmov 0   ;;  %s955_s29 = smov [#allocation8]  }
  0x22   :  { %762 = vmatpush3.msk.msra.mxu0 %vm154_vm0, %v72_v2  ;;  %781 = vmatprep.mubr.msk.f32.mxu0 %vm129_vm1, %v73_v5  ;;  %v68_v7 = vld [vmem:[%s1128_s0 + $0x28] sm:$0xff]  ;;  %v67_v10 = vld [vmem:[%s1128_s0 + $0x20] sm:$0xff]  ;;  %v66_v13 = vld [vmem:[%s1128_s0 + $0x18] sm:$0xff]  ;;  %s690_s30 = sshll.u32 %s955_s29, 4  ;;  %s691_s30 = int_to_ptr.vmem [resolvable:$true] %s690_s30 }
  0x23   :  { %763 = vmatprep.subr.mxu0 %v71_v3  ;;  %v86_v9 = vld [vmem:[%s1130_s2 + $0x28] sm:$0xff]  ;;  %126 = vperm.xlu0 %848, %v88_v8   ;;  %v85_v12 = vld [vmem:[%s1130_s2 + $0x20] sm:$0xff]  ;;  %v65_v14 = vld [vmem:[%s1128_s0 + $0x10] sm:$0xff]  ;;  %s922_s10 = scalar_lea.vmem %s691_s30, 16  ;;  %s926_s11 = scalar_lea.vmem %s691_s30, 32 }
  0x24   :  { %764 = vmatpush3.msra.mxu0 %v71_v3  ;;  %116 = vperm.xlu1 %849, %v86_v9   ;;  %v84_v15 = vld [vmem:[%s1130_s2 + $0x18] sm:$0xff]  ;;  %v83_v16 = vld [vmem:[%s1130_s2 + $0x10] sm:$0xff]  ;;  %v64_v17 = vld [vmem:[%s1128_s0 + $0x8] sm:$0xff]  ;;  %p923_p10 = scmp.ne.s32.totalorder %s691_s30, %s922_s10  ;;  %p927_p11 = scmp.lt.s32.totalorder %s691_s30, %s691_s30 }
  0x25   :  { %765 = vmatprep.subr.mxu0 %v70_v4  ;;  %v63_v18 = vld [vmem:[%s1128_s0] sm:$0xff]  ;;  %v82_v19 = vld [vmem:[%s1130_s2 + $0x8] sm:$0xff]  ;;  %v75_v22 = vld [vmem:[#allocation3 + $0x10] sm:$0xff]  ;;  %p928_p12 = scmp.lt.s32.totalorder %s926_s11, %s922_s10 }
  0x26   :  { %766 = vmatpush3.msra.mxu0 %v70_v4  ;;  %v81_v20 = vld [vmem:[%s1130_s2] sm:$0xff]  ;;  %v74_v21 = vld [vmem:[#allocation3 + $0x8] sm:$0xff]  ;;  %v310_v23 = vld [vmem:[%s1132_s4 + $0x18] sm:$0xff] }
  0x27   :  { %767 = vmatprep.subr.mxu0 %v69_v6  ;;  %121 = vperm.xlu0 %848, %v87_v11   ;;  %v309_v24 = vld [vmem:[%s1132_s4 + $0x10] sm:$0xff]  ;;  %v76_v25 = vld [vmem:[#allocation3 + $0x18] sm:$0xff]  ;;  %v77_v26 = vld [vmem:[#allocation3 + $0x20] sm:$0xff]  ;;  %p929_p13 = por %p928_p12, %p927_p11 }
  0x28   :  { %768 = vmatpush3.msra.mxu0 %v69_v6  ;;  %111 = vperm.xlu1 %849, %v85_v12   ;;  %v308_v27 = vld [vmem:[%s1132_s4 + $0x8] sm:$0xff]  ;;  %v307_v28 = vld [vmem:[%s1132_s4] sm:$0xff]  ;;  %v79_v30 = vld [vmem:[#allocation3 + $0x30] sm:$0xff] }
  0x29   :  { %769 = vmatprep.subr.mxu0 %v68_v7  ;;  %v78_v29 = vld [vmem:[#allocation3 + $0x28] sm:$0xff]  ;;  %v456_v31 = vld [vmem:[%s1134_s6 + $0x18] sm:$0xff]  ;;  %v453_v35 = vld [vmem:[%s1134_s6] sm:$0xff]  ;;  %p930_p0 = pnand %p929_p13, %p923_p10 }
  0x2a   :  { %770 = vmatpush3.msra.mxu0 %v68_v7  ;;  %v455_v32 = vld [vmem:[%s1134_s6 + $0x10] sm:$0xff]  ;;  %v80_v33 = vld [vmem:[#allocation3 + $0x38] sm:$0xff]  ;;  %v454_v34 = vld [vmem:[%s1134_s6 + $0x8] sm:$0xff] }
  0x2b   :  { %771 = vmatprep.subr.mxu0 %v67_v10  ;;  %106 = vperm.xlu0 %848, %v84_v15   ;;  %v600_v36 = vld [vmem:[#allocation2] sm:$0x1] }
  0x2c   :  { %772 = vmatpush3.msra.mxu0 %v67_v10  ;;  %101 = vperm.xlu1 %849, %v83_v16   ;;  %v303_v37 = vld [vmem:[%s1131_s3] sm:$0xff] }
  0x2d   :  { %773 = vmatprep.subr.mxu0 %v66_v13  ;;  %809 = vmatprep.mubr.msk.f32.mxu1 %vm331_vm2, %v303_v37 }
  0x2e   :  { %774 = vmatpush3.msra.mxu0 %v66_v13 }
  0x2f   :  { %775 = vmatprep.subr.mxu0 %v65_v14  ;;  %96 = vperm.xlu0 %848, %v82_v19  }
  0x30   :  { %776 = vmatpush3.msra.mxu0 %v65_v14  ;;  %91 = vperm.xlu1 %849, %v81_v20  }
  0x31   :  { %777 = vmatprep.subr.mxu0 %v64_v17 }
  0x32   :  { %778 = vmatpush3.msra.mxu0 %v64_v17 }
  0x33   :  { %779 = vmatprep.subr.mxu0 %v63_v18  ;;  %328 = vperm.xlu0 %848, %v310_v23  }
  0x34   :  { %780 = vmatpush3.msra.mxu0 %v63_v18  ;;  %323 = vperm.xlu1 %849, %v309_v24  }
  0x35   :  { %782 = vmatmul.mubr.msk.f32.vlgmr.msra.gmra.mxu0 %vm129_vm1, %v74_v21 }
  0x36   :  { %784 = vmatprep.mubr.msk.f32.mxu0 %vm129_vm1, %v75_v22 }
  0x37   :  { %318 = vperm.xlu0 %848, %v308_v27  }
  0x38   :  { %313 = vperm.xlu1 %849, %v307_v28  }
  0x39   :  { %785 = vmatmul.mubr.msk.f32.gmra.mxu0 %vm129_vm1, %v76_v25 }
  0x3a   :  { %787 = vmatprep.mubr.msk.f32.mxu0 %vm129_vm1, %v77_v26 }
  0x3b   :  { %474 = vperm.xlu0 %848, %v456_v31  }
  0x3c   :  { %469 = vperm.xlu1 %849, %v455_v32  }
  0x3d   :  { %788 = vmatmul.mubr.msk.f32.gmra.mxu0 %vm129_vm1, %v78_v29 }
  0x3e   :  { %790 = vmatprep.mubr.msk.f32.mxu0 %vm129_vm1, %v79_v30 }
  0x3f   :  { %464 = vperm.xlu0 %848, %v454_v34  }
  0x40   :  { %459 = vperm.xlu1 %849, %v453_v35  }
  0x41   :  { %791 = vmatmul.mubr.msk.f32.gmra.mxu0 %vm129_vm1, %v80_v33 }
  0x43   :  { %603 = vperm.xlu0 %848, %v600_v36  }
  0x9e   :  { %v127_v38 = vpop.permute.xlu0 %126 }
  0x9f   :  { %v117_v39 = vpop.permute.xlu1 %116 }
  0xa2   :  { %v122_v42 = vpop.permute.xlu0 %121 }
  0xa3   :  { %v112_v44 = vpop.permute.xlu1 %111 }
  0xa6   :  { %v107_v48 = vpop.permute.xlu0 %106 }
  0xa7   :  { %v102_v51 = vpop.permute.xlu1 %101 }
  0xaa   :  { %v97_v61 = vpop.permute.xlu0 %96 }
  0xab   :  { %v92_v1 = vpop.permute.xlu1 %91 }
  0xf5   :  { %v783_v40 = vpop.f32.mrf.mxu0 }
  0xf6   :  { %v230_v62 = vadd.f32 %v783_v40, %v97_v61  ;;  %v306_v40 = vld [vmem:[%s1131_s3 + $0x18] sm:$0xff] }
  0xf7   :  { %v224_v41 = vpop.f32.mrf.mxu0 }
  0xf8   :  { %v225_v2 = vadd.f32 %v224_v41, %v92_v1  ;;  %v272_v4 = vmul.f32 0.70710677, %v230_v62  ;;  %v264_v32 = vmul.f32 0.5, %v230_v62  ;;  %v449_v41 = vld [vmem:[#allocation6] sm:$0xff] }
  0xf9   :  { %v786_v43 = vpop.f32.mrf.mxu0 }
  0xfa   :  { %v240_v54 = vadd.f32 %v786_v43, %v107_v48  ;;  %v271_v5 = vmul.f32 0.70710677, %v225_v2  ;;  %v263_v35 = vmul.f32 0.5, %v225_v2  ;;  %v324_v43 = vpop.permute.xlu1 %323 }
  0xfb   :  { %v234_v45 = vpop.f32.mrf.mxu0 }
  0xfc   :  { %v235_v58 = vadd.f32 %v234_v45, %v102_v51  ;;  %v274_v63 = vmul.f32 0.70710677, %v240_v54  ;;  %v266_v25 = vmul.f32 0.5, %v240_v54 }
  0xfd   :  { %v789_v46 = vpop.f32.mrf.mxu0 }
  0xfe   :  { %v250_v47 = vadd.f32 %v789_v46, %v117_v39  ;;  %v273_v3 = vmul.f32 0.70710677, %v235_v58  ;;  %v265_v29 = vmul.f32 0.5, %v235_v58  ;;  %v305_v39 = vld [vmem:[%s1131_s3 + $0x10] sm:$0xff] }
  0xff   :  { %v244_v49 = vpop.f32.mrf.mxu0 }
 0x100   :  { %v245_v50 = vadd.f32 %v244_v49, %v112_v44  ;;  %v276_v52 = vmul.f32 0.70710677, %v250_v47  ;;  %v268_v17 = vmul.f32 0.5, %v250_v47  ;;  %v314_v47 = vpop.permute.xlu1 %313 }
 0x101   :  { %v792_v53 = vpop.f32.mrf.mxu0 }
 0x102   :  { %v260_v55 = vadd.f32 %v792_v53, %v127_v38  ;;  %v275_v56 = vmul.f32 0.70710677, %v245_v50  ;;  %850 = verf.f32 %v276_v52  ;;  %v267_v21 = vmul.f32 0.5, %v245_v50  ;;  %v304_v38 = vld [vmem:[%s1131_s3 + $0x8] sm:$0xff] }
 0x103   :  { %v254_v57 = vpop.f32.mrf.mxu0 }
 0x104   :  { %v278_v59 = vmul.f32 0.70710677, %v260_v55  ;;  %v255_v60 = vadd.f32 %v254_v57, %v122_v42  ;;  %v270_v9 = vmul.f32 0.5, %v260_v55  ;;  %v329_v42 = vpop.permute.xlu0 %328 }
 0x106   :  { %852 = verf.f32 %v278_v59  ;;  %v277_v0 = vmul.f32 0.70710677, %v255_v60  ;;  %v269_v12 = vmul.f32 0.5, %v255_v60 }
 0x107   :  { %854 = verf.f32 %v275_v56 }
 0x108   :  { %856 = verf.f32 %v277_v0  ;;  %v319_v44 = vpop.permute.xlu0 %318 }
 0x109   :  { %858 = verf.f32 %v274_v63 }
 0x10a   :  { %860 = verf.f32 %v273_v3 }
 0x10b   :  { %862 = verf.f32 %v272_v4 }
 0x10c   :  { %864 = verf.f32 %v271_v5 }
 0x10f   :  { %v851_v6 = vpop.eup %850 }
 0x110   :  { %v292_v15 = vadd.f32 1.0, %v851_v6 }
 0x112   :  { %v300_v22 = vmul.f32 %v292_v15, %v268_v17  ;;  %v470_v15 = vpop.permute.xlu1 %469 }
 0x113   :  { %v853_v7 = vpop.eup %852 }
 0x114   :  { %v855_v8 = vpop.eup %854  ;;  %v294_v10 = vadd.f32 1.0, %v853_v7 }
 0x115   :  { %v857_v11 = vpop.eup %856  ;;  %v291_v19 = vadd.f32 1.0, %v855_v8 }
 0x116   :  { %v302_v13 = vmul.f32 %v294_v10, %v270_v9  ;;  %v293_v14 = vadd.f32 1.0, %v857_v11  ;;  %v859_v16 = vpop.eup %858  ;;  %v450_v10 = vld [vmem:[#allocation6 + $0x8] sm:$0xff]  ;;  %v451_v11 = vld [vmem:[#allocation6 + $0x10] sm:$0xff] }
 0x117   :  { %v861_v20 = vpop.eup %860  ;;  %v290_v23 = vadd.f32 1.0, %v859_v16  ;;  %v299_v26 = vmul.f32 %v291_v19, %v267_v21  ;;  %v460_v19 = vpop.permute.xlu1 %459 }
 0x118   :  { %793 = vmatprep.subr.mxu1 %v302_v13  ;;  %v301_v18 = vmul.f32 %v293_v14, %v269_v12  ;;  %v863_v24 = vpop.eup %862  ;;  %v289_v27 = vadd.f32 1.0, %v861_v20  ;;  %v452_v12 = vld [vmem:[#allocation6 + $0x18] sm:$0xff]  ;;  %v475_v14 = vpop.permute.xlu0 %474 }
 0x119   :  { %794 = vmatpush3.msra.mxu1 %v302_v13  ;;  %v865_v28 = vpop.eup %864  ;;  %v298_v30 = vmul.f32 %v290_v23, %v266_v25  ;;  %v288_v31 = vadd.f32 1.0, %v863_v24  ;;  %v953_v13 = vmov 0.0  }
 0x11a   :  { %795 = vmatprep.subr.mxu1 %v301_v18  ;;  %v297_v33 = vmul.f32 %v289_v27, %v265_v29  ;;  %v287_v34 = vadd.f32 1.0, %v865_v28 }
 0x11b   :  { %796 = vmatpush3.msra.mxu1 %v301_v18  ;;  %v296_v36 = vmul.f32 %v288_v31, %v264_v32 }
 0x11c   :  { %797 = vmatprep.subr.mxu1 %v300_v22  ;;  %v295_v37 = vmul.f32 %v287_v34, %v263_v35  ;;  %v465_v16 = vpop.permute.xlu0 %464 }
 0x11d   :  { %798 = vmatpush3.msra.mxu1 %v300_v22 }
 0x11e   :  { %799 = vmatprep.subr.mxu1 %v299_v26 }
 0x11f   :  { %800 = vmatpush3.msra.mxu1 %v299_v26 }
 0x120   :  { %801 = vmatprep.subr.mxu1 %v298_v30 }
 0x121   :  { %802 = vmatpush3.msra.mxu1 %v298_v30 }
 0x122   :  { %803 = vmatprep.subr.mxu1 %v297_v33 }
 0x123   :  { %804 = vmatpush3.msra.mxu1 %v297_v33 }
 0x124   :  { %805 = vmatprep.subr.mxu1 %v296_v36 }
 0x125   :  { %806 = vmatpush3.msra.mxu1 %v296_v36 }
 0x126   :  { %807 = vmatprep.subr.mxu1 %v295_v37 }
 0x127   :  { %808 = vmatpush3.msra.mxu1 %v295_v37 }
 0x128   :  { %810 = vmatmul.mubr.msk.f32.vlgmr.msra.gmra.mxu1 %vm331_vm2, %v304_v38 }
 0x129   :  { %812 = vmatprep.mubr.msk.f32.mxu1 %vm331_vm2, %v305_v39 }
 0x12c   :  { %813 = vmatmul.mubr.msk.f32.gmra.mxu1 %vm331_vm2, %v306_v40 }
 0x12d   :  { %823 = vmatprep.mubr.msk.f32.mxu1 %vm477_vm3, %v449_v41 }
 0x1e8   :  { %v811_v45 = vpop.f32.mrf.mxu1 }
 0x1e9   :  { %v416_v46 = vadd.f32 %v811_v45, %v319_v44 }
 0x1ea   :  { %v410_v48 = vpop.f32.mrf.mxu1 }
 0x1eb   :  { %v411_v49 = vadd.f32 %v410_v48, %v314_v47  ;;  %v434_v50 = vmul.f32 0.70710677, %v416_v46  ;;  %v430_v4 = vmul.f32 0.5, %v416_v46 }
 0x1ec   :  { %v814_v51 = vpop.f32.mrf.mxu1 }
 0x1ed   :  { %v426_v52 = vadd.f32 %v814_v51, %v329_v42  ;;  %v433_v53 = vmul.f32 0.70710677, %v411_v49  ;;  %866 = verf.f32 %v434_v50  ;;  %v429_v7 = vmul.f32 0.5, %v411_v49  ;;  %v599_v50 = vld [vmem:[%s1135_s7] sm:$0x1] }
 0x1ee   :  { %v420_v54 = vpop.f32.mrf.mxu1  ;;  %v606_v51 = vlaneseq }
 0x1ef   :  { %v436_v55 = vmul.f32 0.70710677, %v426_v52  ;;  %v421_v56 = vadd.f32 %v420_v54, %v324_v43  ;;  %v432_v61 = vmul.f32 0.5, %v426_v52  ;;  %v604_v54 = vpop.permute.xlu0 %603 }
 0x1f0   :  { %v607_v52 = vshrl.u32 %v606_v51, 7 }
 0x1f1   :  { %868 = verf.f32 %v436_v55  ;;  %v435_v57 = vmul.f32 0.70710677, %v421_v56  ;;  %v431_v0 = vmul.f32 0.5, %v421_v56 }
 0x1f2   :  { %870 = verf.f32 %v433_v53  ;;  %v608_v53 = vsub.s32 0, %v607_v52 }
 0x1f3   :  { %872 = verf.f32 %v435_v57 }
 0x1f4   :  { %v609_v55 = vrot.slane %v604_v54, %v608_v53 }
 0x1fa   :  { %v867_v58 = vpop.eup %866 }
 0x1fb   :  { %v442_v3 = vadd.f32 1.0, %v867_v58 }
 0x1fd   :  { %v446_v8 = vmul.f32 %v442_v3, %v430_v4 }
 0x1fe   :  { %v869_v59 = vpop.eup %868 }
 0x1ff   :  { %v871_v60 = vpop.eup %870  ;;  %v444_v62 = vadd.f32 1.0, %v869_v59 }
 0x200   :  { %v873_v63 = vpop.eup %872  ;;  %v441_v6 = vadd.f32 1.0, %v871_v60 }
 0x201   :  { %v448_v1 = vmul.f32 %v444_v62, %v432_v61  ;;  %v443_v2 = vadd.f32 1.0, %v873_v63 }
 0x202   :  { %v445_v9 = vmul.f32 %v441_v6, %v429_v7 }
 0x203   :  { %815 = vmatprep.subr.mxu1 %v448_v1  ;;  %v447_v5 = vmul.f32 %v443_v2, %v431_v0 }
 0x204   :  { %816 = vmatpush3.msra.mxu1 %v448_v1 }
 0x205   :  { %817 = vmatprep.subr.mxu1 %v447_v5 }
 0x206   :  { %818 = vmatpush3.msra.mxu1 %v447_v5 }
 0x207   :  { %819 = vmatprep.subr.mxu1 %v446_v8 }
 0x208   :  { %820 = vmatpush3.msra.mxu1 %v446_v8 }
 0x209   :  { %821 = vmatprep.subr.mxu1 %v445_v9 }
 0x20a   :  { %822 = vmatpush3.msra.mxu1 %v445_v9 }
 0x20b   :  { %824 = vmatmul.mubr.msk.f32.vlgmr.msra.gmra.mxu1 %vm477_vm3, %v450_v10  ;;  %829 = vmatprep.subr.mxu1 %v953_v13 }
 0x20c   :  { %826 = vmatprep.mubr.msk.f32.mxu1 %vm477_vm3, %v451_v11 }
 0x20f   :  { %827 = vmatmul.mubr.msk.f32.gmra.mxu1 %vm477_vm3, %v452_v12 }
 0x210   :  { %837 = vmatprep.mubr.msk.f32.mxu1 %vm954_vm4, %v953_v13 }
 0x2cb   :  { %v825_v17 = vpop.f32.mrf.mxu1 }
 0x2cc   :  { %v562_v18 = vadd.f32 %v825_v17, %v465_v16 }
 0x2cd   :  { %v556_v20 = vpop.f32.mrf.mxu1 }
 0x2ce   :  { %v557_v21 = vadd.f32 %v556_v20, %v460_v19  ;;  %v576_v22 = vadd.f32 %v562_v18, %v446_v8 }
 0x2cf   :  { %v828_v23 = vpop.f32.mrf.mxu1 }
 0x2d0   :  { %v575_v24 = vadd.f32 %v557_v21, %v445_v9  ;;  %v572_v25 = vadd.f32 %v828_v23, %v475_v14  ;;  %v584_v28 = vmul.f32 0.70710677, %v576_v22  ;;  %v580_v44 = vmul.f32 0.5, %v576_v22 }
 0x2d1   :  { %v566_v26 = vpop.f32.mrf.mxu1 }
 0x2d2   :  { %v578_v27 = vadd.f32 %v572_v25, %v448_v1  ;;  %v567_v29 = vadd.f32 %v566_v26, %v470_v15  ;;  %v583_v30 = vmul.f32 0.70710677, %v575_v24  ;;  %v579_v48 = vmul.f32 0.5, %v575_v24 }
 0x2d4   :  { %v586_v31 = vmul.f32 0.70710677, %v578_v27  ;;  %v577_v32 = vadd.f32 %v567_v29, %v447_v5  ;;  %v582_v36 = vmul.f32 0.5, %v578_v27 }
 0x2d6   :  { %874 = verf.f32 %v586_v31  ;;  %v585_v33 = vmul.f32 0.70710677, %v577_v32  ;;  %v581_v42 = vmul.f32 0.5, %v577_v32 }
 0x2d7   :  { %876 = verf.f32 %v584_v28 }
 0x2d8   :  { %878 = verf.f32 %v583_v30 }
 0x2d9   :  { %880 = verf.f32 %v585_v33 }
 0x2e3   :  { %v875_v34 = vpop.eup %874 }
 0x2e4   :  { %v877_v35 = vpop.eup %876  ;;  %v594_v37 = vadd.f32 1.0, %v875_v34 }
 0x2e5   :  { %v879_v38 = vpop.eup %878  ;;  %v592_v41 = vadd.f32 1.0, %v877_v35 }
 0x2e6   :  { %v881_v39 = vpop.eup %880  ;;  %v598_v40 = vmul.f32 %v594_v37, %v582_v36  ;;  %v591_v45 = vadd.f32 1.0, %v879_v38 }
 0x2e7   :  { %v593_v43 = vadd.f32 1.0, %v881_v39  ;;  %v596_v47 = vmul.f32 %v592_v41, %v580_v44 }
 0x2e8   :  { %830 = vmatpush3.msra.mxu1 %v598_v40  ;;  %v595_v49 = vmul.f32 %v591_v45, %v579_v48 }
 0x2e9   :  { %v597_v46 = vmul.f32 %v593_v43, %v581_v42  ;;  %831 = vmatprep.subr.mxu1 %v953_v13 }
 0x2eb   :  { %832 = vmatpush3.msra.mxu1 %v597_v46 }
 0x2ec   :  { %833 = vmatprep.subr.mxu1 %v953_v13 }
 0x2ed   :  { %834 = vmatpush3.msra.mxu1 %v596_v47 }
 0x2ee   :  { %835 = vmatprep.subr.mxu1 %v953_v13 }
 0x2ef   :  { %836 = vmatpush3.msra.mxu1 %v595_v49 }
 0x2f0   :  { %838 = vmatmul.mubr.msk.f32.vlgmr.msra.gmra.mxu1 %vm477_vm3, %v599_v50 }
 0x3b0   :  { %v679_v56 = vpop.f32.mrf.mxu1 }
 0x3b1   :  { %v680_v57 = vadd.f32 %v679_v56, %v609_v55 }
 0x3b2   :  { %v839_v58 = vpop.f32.mrf.mxu1 }
 0x3b3   :  { %683 = vst [vmem:[#allocation8] sm:$0x1] %v680_v57 }
 0x3b4   :  { %933 = shalt.err (!%p930_p0)
}
 0x3b5   :  { %693 = dma.vmem_to_hbm [thread:$0]  %s691_s30, 16, %s1137_s9, [#allocation5]  }
 0x3b6   :  { %946 = dma.done.wait [#allocation5], 16  }
 0x3b7   :  { %947 = vsyncadd [#allocation5], 4294967280 }
 0x3b8   :  { %697 = vsyncpa [#allocation4], 1 }
 0x3b9   :  { %698 = vsyncpa [#allocation7], 1 }
 0x3ba   :  { %699 = vsyncpa [#allocation5], 1 }

</bundles_post_ra>
